<compile_context>
chip_gen: v5e
topology: v5e:2x2
jax: 0.10.0
libtpu: 0.0.40
codegen_flags: <defaults>
</compile_context>

<pallas_src>
import functools

import jax
import jax.numpy as jnp
import numpy as np
from jax.experimental import pallas as pl
from jax.experimental.pallas import tpu as pltpu


@functools.lru_cache(maxsize=None)
def _interp_matrix(out_size: int, in_size: int) -> np.ndarray:
    """PyTorch bilinear (align_corners=False) 1-D interpolation matrix (out, in)."""
    i = np.arange(out_size, dtype=np.float64)
    s = (i + 0.5) * (in_size / out_size) - 0.5
    s = np.maximum(s, 0.0)
    i0 = np.minimum(np.floor(s).astype(np.int64), in_size - 1)
    i1 = np.minimum(i0 + 1, in_size - 1)
    f = s - i0
    a = np.zeros((out_size, in_size), dtype=np.float64)
    a[np.arange(out_size), i0] += 1.0 - f
    a[np.arange(out_size), i1] += f
    return a.astype(np.float32)


def _choose_tiles(n, c, h_out, w_out, itemsize):
    """Pick (batch_tile, channel_tile) so each x block is 'big enough'."""
    spatial_bytes = h_out * w_out * itemsize
    total_bytes = n * c * spatial_bytes
    # Tiny problem: run the whole thing in one grid step (per-step overhead
    # would otherwise dominate).
    if total_bytes <= (512 << 10) and n <= 8:
        return n, c
    # One sample per batch step; tile channels so each x block is ~1 MiB.
    # (in+out double-buffered -> ~4 MiB resident, comfortably inside VMEM.)
    target = 1 << 20
    bc = max(1, min(c, target // spatial_bytes))
    while c % bc:
        bc -= 1
    return 1, bc


def _attention_kernel(params_ref, ah_ref, awt_ref, t_ref, x_ref, o_ref, mask_ref):
    # params_ref : SMEM (2,)              [alpha, beta]; mask = sigmoid(alpha*interp + beta)
    # ah_ref     : VMEM (H, h)            row (height) interp matrix, shared
    # awt_ref    : VMEM (w, W)            column (width) interp matrix, transposed, shared
    # t_ref      : VMEM (BN, 1, h, w)     low-res trans_map for this batch tile
    # x_ref      : VMEM (BN, BC, H, W)
    # o_ref      : VMEM (BN, BC, H, W)
    # mask_ref   : VMEM (BN, H, W) f32    scratch, carried across channel tiles
    bn = mask_ref.shape[0]

    # Compute the mask once per batch tile; reuse it for every channel tile.
    @pl.when(pl.program_id(1) == 0)
    def _():
        a_h = ah_ref[...]                  # (H, h)
        a_wt = awt_ref[...]                # (w, W)
        alpha = params_ref[0]
        beta = params_ref[1]
        for n in range(bn):                # static, unrolled; bn is tiny
            t_n = t_ref[n, 0]                                               # (h, w)
            s1 = jnp.dot(a_h, t_n, preferred_element_type=jnp.float32)      # (H, w)
            interp = jnp.dot(s1, a_wt, preferred_element_type=jnp.float32)  # (H, W)
            z = alpha * interp + beta
            # sigmoid(z) = 0.5 * (1 + tanh(z/2)): EUP tanh, no f32 VPU divide.
            mask_ref[n] = 0.5 * (1.0 + jnp.tanh(0.5 * z))

    # Broadcast multiply over channels; done in x's dtype (bf16 stays bf16 on
    # v6e/v7x, f32 stays f32 — exact for the f32 test).
    m = mask_ref[...][:, None, :, :].astype(o_ref.dtype)                    # (BN,1,H,W)
    o_ref[...] = x_ref[...] * m


def attention_forward(x, trans_map, conv_weight, conv_bias):
    """x: (N,C,H,W); trans_map: (N,1,h,w); conv_weight: (1,1,1,1); conv_bias: (1,)."""
    N, C, H, W = x.shape
    _, _, h, w = trans_map.shape

    # Separable bilinear-interp matrices (cached on shape; constants under jit).
    a_h = jnp.asarray(_interp_matrix(H, h))        # (H, h)
    a_wt = jnp.asarray(_interp_matrix(W, w).T)     # (w, W)

    wv = conv_weight.reshape(()).astype(jnp.float32)
    bv = conv_bias.reshape(()).astype(jnp.float32)
    # sigmoid(w*(1 - t) + b) == sigmoid(-w*t + (w + b))
    params = jnp.stack([-wv, wv + bv])

    bn, bc = _choose_tiles(N, C, H, W, x.dtype.itemsize)
    grid = (N // bn, C // bc)

    out = pl.pallas_call(
        _attention_kernel,
        out_shape=jax.ShapeDtypeStruct((N, C, H, W), x.dtype),
        grid=grid,
        in_specs=[
            pl.BlockSpec(memory_space=pltpu.MemorySpace.SMEM),             # params
            pl.BlockSpec((H, h), lambda n, c: (0, 0)),                     # A_H
            pl.BlockSpec((w, W), lambda n, c: (0, 0)),                     # A_W^T
            pl.BlockSpec((bn, 1, h, w), lambda n, c: (n, 0, 0, 0)),        # trans_map
            pl.BlockSpec((bn, bc, H, W), lambda n, c: (n, c, 0, 0)),       # x
        ],
        out_specs=pl.BlockSpec((bn, bc, H, W), lambda n, c: (n, c, 0, 0)),
        scratch_shapes=[pltpu.VMEM((bn, H, W), jnp.float32)],              # mask
        compiler_params=pltpu.CompilerParams(
            # batch tiles are independent (megacore-parallel); channel tiles
            # carry the mask scratch, so they must run in order.
            dimension_semantics=("parallel", "arbitrary"),
            vmem_limit_bytes=32 * 1024 * 1024,
        ),
    )(params, a_h, a_wt, trans_map.astype(jnp.float32), x)

    return out


def _reference(x, trans_map, conv_weight, conv_bias):
    """Pure-JAX reference mirroring the PyTorch forward (gather-based bilinear)."""
    N, C, H, W = x.shape
    _, _, h, w = trans_map.shape

    def coords(out_size, in_size):
        i = jnp.arange(out_size, dtype=jnp.float32)
        s = (i + 0.5) * (in_size / out_size) - 0.5
        s = jnp.maximum(s, 0.0)
        i0 = jnp.minimum(jnp.floor(s).astype(jnp.int32), in_size - 1)
        i1 = jnp.minimum(i0 + 1, in_size - 1)
        f = s - i0.astype(jnp.float32)
        return i0, i1, f

    r0, r1, rf = coords(H, h)
    c0, c1, cf = coords(W, w)
    t = trans_map
    gather = lambda ri, ci: t[:, :, ri[:, None], ci[None, :]]      # (N,1,H,W)
    top = gather(r0, c0) * (1.0 - cf) + gather(r0, c1) * cf
    bot = gather(r1, c0) * (1.0 - cf) + gather(r1, c1) * cf
    interp = top * (1.0 - rf[:, None]) + bot * rf[:, None]

    wv = conv_weight.reshape(())
    bv = conv_bias.reshape(())
    mask = jax.nn.sigmoid(wv * (1.0 - interp) + bv)                # (N,1,H,W)
    return x * mask


if __name__ == "__main__":
    N, C, H, W = 2, 4, 16, 16
    h, w = 8, 8

    key = jax.random.PRNGKey(0)
    kx, kt, kw, kb = jax.random.split(key, 4)

    x = jax.random.normal(kx, (N, C, H, W), dtype=jnp.float32)
    trans_map = jax.random.uniform(kt, (N, 1, h, w), dtype=jnp.float32)
    conv_weight = jax.random.normal(kw, (1, 1, 1, 1), dtype=jnp.float32) * 0.5
    conv_bias = jax.random.normal(kb, (1,), dtype=jnp.float32) * 0.1

    # jit so the (cached) interp matrices are baked in once and the whole
    # forward is a single compiled computation.
    fwd = jax.jit(attention_forward)
    out = jax.block_until_ready(fwd(x, trans_map, conv_weight, conv_bias))

    ref = jax.block_until_ready(_reference(x, trans_map, conv_weight, conv_bias))
    np.testing.assert_allclose(np.asarray(out), np.asarray(ref), rtol=2e-5, atol=2e-5)

    print("KERNEL_OK")
</pallas_src>

<mosaic_0001>
module attributes {stable_mosaic.version = 11 : i64} {
  func.func @_attention_kernel(%arg0: i32, %arg1: i32, %arg2: memref<2xf32, #tpu.memory_space<smem>>, %arg3: memref<16x8xf32, #tpu.memory_space<vmem>>, %arg4: memref<8x16xf32, #tpu.memory_space<vmem>>, %arg5: memref<2x1x8x8xf32, #tpu.memory_space<vmem>>, %arg6: memref<2x4x16x16xf32, #tpu.memory_space<vmem>>, %arg7: memref<2x4x16x16xf32, #tpu.memory_space<vmem>>, %arg8: memref<2x16x16xf32, #tpu.memory_space<vmem>>) attributes {dimension_semantics = [#tpu.dimension_semantics<parallel>, #tpu.dimension_semantics<arbitrary>], iteration_bounds = array<i64: 1, 1>, scalar_prefetch = 0 : i64, scratch_operands = 1 : i64, tpu.core_type = #tpu.core_type<tc>, window_params = [{transform_indices = @transform_0, window_bounds = array<i64: 2>}, {pipeline_mode = #tpu.pipeline_mode<synchronous>, transform_indices = @transform_1, window_bounds = array<i64: 16, 8>}, {pipeline_mode = #tpu.pipeline_mode<synchronous>, transform_indices = @transform_2, window_bounds = array<i64: 8, 16>}, {transform_indices = @transform_3, window_bounds = array<i64: 2, 1, 8, 8>}, {transform_indices = @transform_4, window_bounds = array<i64: 2, 4, 16, 16>}, {transform_indices = @transform_5, window_bounds = array<i64: 2, 4, 16, 16>}]} {
    %c0_i32 = arith.constant 0 : i32
    %0 = arith.cmpi eq, %arg1, %c0_i32 : i32
    %1 = arith.extui %0 : i1 to i32
    %c0_i32_0 = arith.constant 0 : i32
    %2 = arith.cmpi ne, %1, %c0_i32_0 : i32
    scf.if %2 {
      %c0_11 = arith.constant 0 : index
      %c0_12 = arith.constant 0 : index
      %9 = vector.load %arg3[%c0_11, %c0_12] : memref<16x8xf32, #tpu.memory_space<vmem>>, vector<16x8xf32>
      %c0_13 = arith.constant 0 : index
      %c0_14 = arith.constant 0 : index
      %10 = vector.load %arg4[%c0_13, %c0_14] : memref<8x16xf32, #tpu.memory_space<vmem>>, vector<8x16xf32>
      %c0_15 = arith.constant 0 : index
      %11 = memref.load %arg2[%c0_15] : memref<2xf32, #tpu.memory_space<smem>>
      %c1 = arith.constant 1 : index
      %12 = memref.load %arg2[%c1] : memref<2xf32, #tpu.memory_space<smem>>
      %c0_16 = arith.constant 0 : index
      %c0_17 = arith.constant 0 : index
      %c0_18 = arith.constant 0 : index
      %c0_19 = arith.constant 0 : index
      %13 = vector.load %arg5[%c0_16, %c0_17, %c0_18, %c0_19] : memref<2x1x8x8xf32, #tpu.memory_space<vmem>>, vector<1x1x8x8xf32>
      %14 = vector.shape_cast %13 : vector<1x1x8x8xf32> to vector<8x8xf32>
      %cst = arith.constant dense<0.000000e+00> : vector<16x8xf32>
      %15 = tpu.matmul %9, %14, %cst {dimension_numbers = #tpu.dot_dimension_numbers<[1], [0], [0], [1], [0, 0, 1, 1], [], []>} : vector<16x8xf32>, vector<8x8xf32>, vector<16x8xf32> -> vector<16x8xf32>
      %cst_20 = arith.constant dense<0.000000e+00> : vector<16x16xf32>
      %16 = tpu.matmul %15, %10, %cst_20 {dimension_numbers = #tpu.dot_dimension_numbers<[1], [0], [0], [1], [0, 0, 1, 1], [], []>} : vector<16x8xf32>, vector<8x16xf32>, vector<16x16xf32> -> vector<16x16xf32>
      %17 = vector.broadcast %11 : f32 to vector<16x16xf32>
      %18 = arith.mulf %17, %16 : vector<16x16xf32>
      %19 = vector.broadcast %12 : f32 to vector<16x16xf32>
      %20 = arith.addf %18, %19 : vector<16x16xf32>
      %cst_21 = arith.constant 5.000000e-01 : f32
      %21 = vector.broadcast %cst_21 : f32 to vector<16x16xf32>
      %22 = arith.mulf %21, %20 : vector<16x16xf32>
      %23 = math.tanh %22 : vector<16x16xf32>
      %cst_22 = arith.constant 1.000000e+00 : f32
      %24 = vector.broadcast %cst_22 : f32 to vector<16x16xf32>
      %25 = arith.addf %24, %23 : vector<16x16xf32>
      %cst_23 = arith.constant 5.000000e-01 : f32
      %26 = vector.broadcast %cst_23 : f32 to vector<16x16xf32>
      %27 = arith.mulf %26, %25 : vector<16x16xf32>
      %c0_24 = arith.constant 0 : index
      %c0_25 = arith.constant 0 : index
      %c0_26 = arith.constant 0 : index
      %28 = vector.load %arg8[%c0_24, %c0_25, %c0_26] : memref<2x16x16xf32, #tpu.memory_space<vmem>>, vector<1x16x16xf32>
      %29 = vector.shape_cast %28 : vector<1x16x16xf32> to vector<16x16xf32>
      %30 = vector.shape_cast %27 : vector<16x16xf32> to vector<1x16x16xf32>
      tpu.vector_store %arg8[%c0_24, %c0_25, %c0_26], %30 {strides = array<i32>} : memref<2x16x16xf32, #tpu.memory_space<vmem>>, vector<1x16x16xf32>,
      %c1_27 = arith.constant 1 : index
      %c0_28 = arith.constant 0 : index
      %c0_29 = arith.constant 0 : index
      %c0_30 = arith.constant 0 : index
      %31 = vector.load %arg5[%c1_27, %c0_28, %c0_29, %c0_30] : memref<2x1x8x8xf32, #tpu.memory_space<vmem>>, vector<1x1x8x8xf32>
      %32 = vector.shape_cast %31 : vector<1x1x8x8xf32> to vector<8x8xf32>
      %cst_31 = arith.constant dense<0.000000e+00> : vector<16x8xf32>
      %33 = tpu.matmul %9, %32, %cst_31 {dimension_numbers = #tpu.dot_dimension_numbers<[1], [0], [0], [1], [0, 0, 1, 1], [], []>} : vector<16x8xf32>, vector<8x8xf32>, vector<16x8xf32> -> vector<16x8xf32>
      %cst_32 = arith.constant dense<0.000000e+00> : vector<16x16xf32>
      %34 = tpu.matmul %33, %10, %cst_32 {dimension_numbers = #tpu.dot_dimension_numbers<[1], [0], [0], [1], [0, 0, 1, 1], [], []>} : vector<16x8xf32>, vector<8x16xf32>, vector<16x16xf32> -> vector<16x16xf32>
      %35 = vector.broadcast %11 : f32 to vector<16x16xf32>
      %36 = arith.mulf %35, %34 : vector<16x16xf32>
      %37 = vector.broadcast %12 : f32 to vector<16x16xf32>
      %38 = arith.addf %36, %37 : vector<16x16xf32>
      %cst_33 = arith.constant 5.000000e-01 : f32
      %39 = vector.broadcast %cst_33 : f32 to vector<16x16xf32>
      %40 = arith.mulf %39, %38 : vector<16x16xf32>
      %41 = math.tanh %40 : vector<16x16xf32>
      %cst_34 = arith.constant 1.000000e+00 : f32
      %42 = vector.broadcast %cst_34 : f32 to vector<16x16xf32>
      %43 = arith.addf %42, %41 : vector<16x16xf32>
      %cst_35 = arith.constant 5.000000e-01 : f32
      %44 = vector.broadcast %cst_35 : f32 to vector<16x16xf32>
      %45 = arith.mulf %44, %43 : vector<16x16xf32>
      %c1_36 = arith.constant 1 : index
      %c0_37 = arith.constant 0 : index
      %c0_38 = arith.constant 0 : index
      %46 = vector.load %arg8[%c1_36, %c0_37, %c0_38] : memref<2x16x16xf32, #tpu.memory_space<vmem>>, vector<1x16x16xf32>
      %47 = vector.shape_cast %46 : vector<1x16x16xf32> to vector<16x16xf32>
      %48 = vector.shape_cast %45 : vector<16x16xf32> to vector<1x16x16xf32>
      tpu.vector_store %arg8[%c1_36, %c0_37, %c0_38], %48 {strides = array<i32>} : memref<2x16x16xf32, #tpu.memory_space<vmem>>, vector<1x16x16xf32>,
    } else {
    }
    %c0 = arith.constant 0 : index
    %c0_1 = arith.constant 0 : index
    %c0_2 = arith.constant 0 : index
    %3 = vector.load %arg8[%c0, %c0_1, %c0_2] : memref<2x16x16xf32, #tpu.memory_space<vmem>>, vector<2x16x16xf32>
    %4 = vector.shape_cast %3 : vector<2x16x16xf32> to vector<2x1x16x16xf32>
    %c0_3 = arith.constant 0 : index
    %c0_4 = arith.constant 0 : index
    %c0_5 = arith.constant 0 : index
    %c0_6 = arith.constant 0 : index
    %5 = vector.load %arg6[%c0_3, %c0_4, %c0_5, %c0_6] : memref<2x4x16x16xf32, #tpu.memory_space<vmem>>, vector<2x4x16x16xf32>
    %6 = vector.broadcast %4 : vector<2x1x16x16xf32> to vector<2x4x16x16xf32>
    %7 = arith.mulf %5, %6 : vector<2x4x16x16xf32>
    %c0_7 = arith.constant 0 : index
    %c0_8 = arith.constant 0 : index
    %c0_9 = arith.constant 0 : index
    %c0_10 = arith.constant 0 : index
    %8 = vector.load %arg7[%c0_7, %c0_8, %c0_9, %c0_10] : memref<2x4x16x16xf32, #tpu.memory_space<vmem>>, vector<2x4x16x16xf32>
    tpu.vector_store %arg7[%c0_7, %c0_8, %c0_9, %c0_10], %7 {strides = array<i32>} : memref<2x4x16x16xf32, #tpu.memory_space<vmem>>, vector<2x4x16x16xf32>,
    return
  }
  func.func @transform_0(%arg0: i32, %arg1: i32) -> i32 {
    %c0_i32 = arith.constant 0 : i32
    %c0_i32_0 = arith.constant 0 : i32
    return %c0_i32 : i32
  }
  func.func @transform_1(%arg0: i32, %arg1: i32) -> (i32, i32) {
    %c0_i32 = arith.constant 0 : i32
    %c0_i32_0 = arith.constant 0 : i32
    %c0_i32_1 = arith.constant 0 : i32
    return %c0_i32, %c0_i32_0 : i32, i32
  }
  func.func @transform_2(%arg0: i32, %arg1: i32) -> (i32, i32) {
    %c0_i32 = arith.constant 0 : i32
    %c0_i32_0 = arith.constant 0 : i32
    %c0_i32_1 = arith.constant 0 : i32
    return %c0_i32, %c0_i32_0 : i32, i32
  }
  func.func @transform_3(%arg0: i32, %arg1: i32) -> (i32, i32, i32, i32) {
    %c0_i32 = arith.constant 0 : i32
    %c0_i32_0 = arith.constant 0 : i32
    %c0_i32_1 = arith.constant 0 : i32
    %c0_i32_2 = arith.constant 0 : i32
    return %arg0, %c0_i32, %c0_i32_0, %c0_i32_1 : i32, i32, i32, i32
  }
  func.func @transform_4(%arg0: i32, %arg1: i32) -> (i32, i32, i32, i32) {
    %c0_i32 = arith.constant 0 : i32
    %c0_i32_0 = arith.constant 0 : i32
    %c0_i32_1 = arith.constant 0 : i32
    return %arg0, %arg1, %c0_i32, %c0_i32_0 : i32, i32, i32, i32
  }
  func.func @transform_5(%arg0: i32, %arg1: i32) -> (i32, i32, i32, i32) {
    %c0_i32 = arith.constant 0 : i32
    %c0_i32_0 = arith.constant 0 : i32
    %c0_i32_1 = arith.constant 0 : i32
    return %arg0, %arg1, %c0_i32, %c0_i32_0 : i32, i32, i32, i32
  }
}

</mosaic_0001>

<bundles_post_ra>
// kernel: attention_forward.1
= control target key start
LH: loop header
LB: loop body
LE: loop exit
PB: predicated region body
PF: predicated region fallthrough
CT: control target
= control target key end

     0   :  { %10 = vsyncpa [#allocation6], 0  ;;  %s544_s0 = inlined_call_operand.vmem [shape: f32[2], index: 0, kind: input, shape index: {}]   ;;  %s545_s1 = inlined_call_operand.hbm [shape: f32[16,8], index: 1, kind: input, shape index: {}]   ;;  %s546_s2 = inlined_call_operand.hbm [shape: f32[8,16], index: 2, kind: input, shape index: {}]   ;;  %s547_s3 = inlined_call_operand.vmem [shape: f32[2,1,8,8], index: 3, kind: input, shape index: {}]   ;;  %s548_s4 = inlined_call_operand.hbm [shape: f32[2,4,16,16], index: 4, kind: input, shape index: {}]   ;;  %s549_s5 = inlined_call_operand.hbm [shape: f32[2,4,16,16], index: 5, kind: output, shape index: {}]  }
   0x1   :  { %11 = vsyncpa [#allocation4], 0 }
   0x2   :  { %12 = vsyncpa [#allocation9], 0  ;;  %s41_s20 = sshll.u32 %s546_s2, 4  ;;  %s42_s20 = int_to_ptr.hbm [resolvable:$true] %s41_s20 }
   0x3   :  { %13 = vsyncpa [#allocation5], 0  ;;  %s449_s21 = smov [#allocation8]   ;;  %s19_s25 = sshll.u32 %s544_s0, 4  ;;  %s20_s25 = int_to_ptr.vmem [resolvable:$true] %s19_s25 }
   0x4   :  { %s43_s22 = sshll.u32 %s449_s21, 4  ;;  %s450_s26 = smov [#allocation3]   ;;  %s44_s22 = int_to_ptr.vmem [resolvable:$true] %s43_s22 }
   0x5   :  { %46 = dma.hbm_to_vmem [thread:$0]  %s42_s20, 128, %s44_s22, [#allocation9]  }
   0x6   :  { %22 = dma.vmem_to_smem %s20_s25, 16, %s450_s26, [#allocation6]  }
   0x7   :  { %s27_s29 = sshll.u32 %s545_s1, 4  ;;  %s451_s30 = smov [#allocation7]   ;;  %s28_s29 = int_to_ptr.hbm [resolvable:$true] %s27_s29 }
   0x8   :  { %s29_s2 = sshll.u32 %s451_s30, 4  ;;  %s53_s8 = sshll.u32 %s548_s4, 4  ;;  %s30_s2 = int_to_ptr.vmem [resolvable:$true] %s29_s2  ;;  %s54_s8 = int_to_ptr.hbm [resolvable:$true] %s53_s8 }
   0x9   :  { %s452_s9 = smov 128   ;;  %s453_s10 = smov 8  }
   0xa   :  { %35 = dma.hbm_to_vmem [thread:$0]  %s28_s29, 256, %s30_s2, [#allocation4], %s452_s9, %s452_s9, %s453_s10  }
   0xb   :  { %s454_s0 = smov [#allocation10]  }
   0xc   :  { %s55_s11 = sshll.u32 %s454_s0, 4  ;;  %s56_s11 = int_to_ptr.vmem [resolvable:$true] %s55_s11 }
   0xd   :  { %61 = dma.hbm_to_vmem [thread:$0]  %s54_s8, 2048, %s56_s11, [#allocation9], %s452_s9, %s452_s9, %s453_s10  }
   0xe   :  { %441 = dma.done.wait [#allocation6], 16  }
   0xf   :  { %442 = vsyncadd [#allocation6], 4294967280 }
  0x10   :  { %443 = dma.done.wait [#allocation4], 256  }
  0x11   :  { %444 = vsyncadd [#allocation4], 4294967040 }
  0x12   :  { %445 = dma.done.wait [#allocation9], 2176  }
  0x13   :  { %446 = vsyncadd [#allocation9], 4294965120 }
  0x14   :  { %78 = sfence }
  0x15   :  { %v313_v0 = vld [vmem:[%s547_s3 + $0x8] sm:$0xff]  ;;  %v83_v1 = vld [vmem:[#allocation7] sm:$0xff]  ;;  %vm89_vm0 = vcmask 64512   ;;  %v85_v4 = vld [vmem:[#allocation8] sm:$0xff]  ;;  %s308_s14 = sld [smem:[#allocation3 + $0x1]]  ;;  %vm162_vm1 = vcmask 130048  }
  0x16   :  { %182 = vmatpush.msra.mxu2 %v313_v0  ;;  %v88_v2 = vld [vmem:[%s547_s3] sm:$0xff]  ;;  %v84_v3 = vld [vmem:[#allocation7 + $0x8] sm:$0xff]  ;;  %211 = vmatpush.msra.mxu3 %v85_v4  ;;  %s86_s3 = sld [smem:[#allocation3]]  ;;  %v238_v31 = vld [vmem:[#allocation10] sm:$0xff]  ;;  %s455_s15 = smov [#allocation11]  }
  0x17   :  { %314 = vmatmul.msk.f32.vlgmr.msra.gmra.mxu2 %vm89_vm0, %v83_v1  ;;  %111 = vmatpush.msra.mxu0 %v88_v2  ;;  %v240_v32 = vld [vmem:[#allocation10 + $0x10] sm:$0xff]  ;;  %v242_v33 = vld [vmem:[#allocation10 + $0x20] sm:$0xff]  ;;  %v239_v45 = vld [vmem:[#allocation10 + $0x8] sm:$0xff]  ;;  %s291_s16 = sshll.u32 %s455_s15, 4  ;;  %s293_s19 = sshll.u32 %s549_s5, 4  ;;  %s292_s16 = int_to_ptr.vmem [resolvable:$true] %s291_s16  ;;  %s294_s19 = int_to_ptr.hbm [resolvable:$true] %s293_s19 }
  0x18   :  { %309 = vmatmul.msk.f32.vlgmr.msra.gmra.mxu0 %vm89_vm0, %v83_v1  ;;  %140 = vmatpush.msra.mxu1 %v85_v4  ;;  %v244_v35 = vld [vmem:[#allocation10 + $0x30] sm:$0xff]  ;;  %v241_v46 = vld [vmem:[#allocation10 + $0x18] sm:$0xff]  ;;  %v243_v47 = vld [vmem:[#allocation10 + $0x28] sm:$0xff] }
  0x19   :  { %v245_v48 = vld [vmem:[#allocation10 + $0x38] sm:$0xff]  ;;  %v246_v56 = vld [vmem:[#allocation10 + $0x40] sm:$0xff]  ;;  %v248_v57 = vld [vmem:[#allocation10 + $0x50] sm:$0xff] }
  0x1a   :  { %v250_v58 = vld [vmem:[#allocation10 + $0x60] sm:$0xff]  ;;  %v252_v60 = vld [vmem:[#allocation10 + $0x70] sm:$0xff]  ;;  %v247_v2 = vld [vmem:[#allocation10 + $0x48] sm:$0xff] }
  0x1b   :  { %v151_v11 = vstv %s308_s14  ;;  %v251_v4 = vld [vmem:[#allocation10 + $0x68] sm:$0xff] }
  0x1c   :  { %v148_v9 = vstv %s86_s3 }
  0x1f   :  { %315 = vmatmul.msk.f32.gmra.mxu2 %vm89_vm0, %v84_v3 }
  0x20   :  { %310 = vmatmul.msk.f32.gmra.mxu0 %vm89_vm0, %v84_v3  ;;  %v249_v3 = vld [vmem:[#allocation10 + $0x58] sm:$0xff] }
  0x95   :  { %v113_v5 = vpop.f32.mrf.mxu0 }
  0x96   :  { %311 = vmatmul.msk.f32.vlgmr.msra.gmra.mxu1 %vm89_vm0, %v113_v5  ;;  %v253_v5 = vld [vmem:[#allocation10 + $0x78] sm:$0xff] }
  0x9a   :  { %v184_v6 = vpop.f32.mrf.mxu2 }
  0x9b   :  { %316 = vmatmul.msk.f32.vlgmr.msra.gmra.mxu3 %vm89_vm0, %v184_v6 }
  0x9d   :  { %v116_v7 = vpop.f32.mrf.mxu0 }
  0x9e   :  { %312 = vmatmul.msk.f32.gmra.mxu1 %vm89_vm0, %v116_v7 }
  0xa2   :  { %v187_v8 = vpop.f32.mrf.mxu2 }
  0xa3   :  { %317 = vmatmul.msk.f32.gmra.mxu3 %vm89_vm0, %v187_v8 }
 0x113   :  { %v142_v10 = vpop.f32.mrf.mxu1 }
 0x114   :  { %v149_v12 = vmul.f32 %v148_v9, %v142_v10 }
 0x116   :  { %v152_v13 = vadd.f32 %v151_v11, %v149_v12 }
 0x118   :  { %v154_v14 = vmul.f32 0.5, %v152_v13 }
 0x11a   :  { %325 = vtanh.f32 %v154_v14 }
 0x11b   :  { %v145_v15 = vpop.f32.mrf.mxu1 }
 0x11c   :  { %v150_v16 = vmul.f32 %v148_v9, %v145_v15 }
 0x11e   :  { %v213_v17 = vpop.f32.mrf.mxu3  ;;  %v153_v18 = vadd.f32 %v151_v11, %v150_v16 }
 0x11f   :  { %v219_v19 = vmul.f32 %v213_v17, %v148_v9 }
 0x120   :  { %v326_v20 = vpop.eup %325  ;;  %v155_v21 = vmul.f32 0.5, %v153_v18 }
 0x121   :  { %v158_v22 = vadd.f32 1.0, %v326_v20  ;;  %v221_v23 = vadd.f32 %v219_v19, %v151_v11 }
 0x122   :  { %327 = vtanh.f32 %v155_v21 }
 0x123   :  { %v160_v24 = vmul.f32 0.5, %v158_v22  ;;  %v223_v25 = vmul.f32 0.5, %v221_v23 }
 0x125   :  { %163 = vst.msk [vmem:[#allocation2] sm:$0xff] %vm162_vm1, %v160_v24  ;;  %329 = vtanh.f32 %v223_v25 }
 0x126   :  { %v216_v26 = vpop.f32.mrf.mxu3 }
 0x127   :  { %v220_v27 = vmul.f32 %v216_v26, %v148_v9 }
 0x128   :  { %v328_v28 = vpop.eup %327 }
 0x129   :  { %v159_v29 = vadd.f32 1.0, %v328_v28  ;;  %v222_v30 = vadd.f32 %v220_v27, %v151_v11 }
 0x12b   :  { %v330_v34 = vpop.eup %329  ;;  %v161_v36 = vmul.f32 0.5, %v159_v29  ;;  %v224_v37 = vmul.f32 0.5, %v222_v30 }
 0x12c   :  { %v234_v38 = vld [vmem:[#allocation2] sm:$0xff]  ;;  %v227_v39 = vadd.f32 1.0, %v330_v34 }
 0x12d   :  { %v254_v40 = vmul.f32 %v238_v31, %v234_v38  ;;  %v256_v41 = vmul.f32 %v240_v32, %v234_v38  ;;  %v258_v42 = vmul.f32 %v242_v33, %v234_v38  ;;  %164 = vst.msk [vmem:[#allocation2 + $0x8] sm:$0xff] %vm162_vm1, %v161_v36  ;;  %v260_v43 = vmul.f32 %v244_v35, %v234_v38 }
 0x12e   :  { %331 = vtanh.f32 %v224_v37  ;;  %v229_v44 = vmul.f32 0.5, %v227_v39 }
 0x12f   :  { %271 = vst.msk [vmem:[#allocation11] sm:$0xff] %vm162_vm1, %v254_v40 }
 0x130   :  { %273 = vst.msk [vmem:[#allocation11 + $0x10] sm:$0xff] %vm162_vm1, %v256_v41 }
 0x131   :  { %275 = vst.msk [vmem:[#allocation11 + $0x20] sm:$0xff] %vm162_vm1, %v258_v42 }
 0x132   :  { %277 = vst.msk [vmem:[#allocation11 + $0x30] sm:$0xff] %vm162_vm1, %v260_v43 }
 0x133   :  { %232 = vst.msk [vmem:[#allocation2 + $0x10] sm:$0xff] %vm162_vm1, %v229_v44 }
 0x134   :  { %v332_v49 = vpop.eup %331  ;;  %v235_v50 = vld [vmem:[#allocation2 + $0x8] sm:$0xff] }
 0x135   :  { %v255_v51 = vmul.f32 %v239_v45, %v235_v50  ;;  %v257_v52 = vmul.f32 %v241_v46, %v235_v50  ;;  %v259_v53 = vmul.f32 %v243_v47, %v235_v50  ;;  %v261_v54 = vmul.f32 %v245_v48, %v235_v50 }
 0x136   :  { %v228_v55 = vadd.f32 1.0, %v332_v49 }
 0x137   :  { %272 = vst.msk [vmem:[#allocation11 + $0x8] sm:$0xff] %vm162_vm1, %v255_v51 }
 0x138   :  { %274 = vst.msk [vmem:[#allocation11 + $0x18] sm:$0xff] %vm162_vm1, %v257_v52  ;;  %v230_v59 = vmul.f32 0.5, %v228_v55 }
 0x139   :  { %276 = vst.msk [vmem:[#allocation11 + $0x28] sm:$0xff] %vm162_vm1, %v259_v53 }
 0x13a   :  { %v236_v61 = vld [vmem:[#allocation2 + $0x10] sm:$0xff]  ;;  %278 = vst.msk [vmem:[#allocation11 + $0x38] sm:$0xff] %vm162_vm1, %v261_v54 }
 0x13b   :  { %v262_v62 = vmul.f32 %v246_v56, %v236_v61  ;;  %v264_v63 = vmul.f32 %v248_v57, %v236_v61  ;;  %v266_v0 = vmul.f32 %v250_v58, %v236_v61  ;;  %233 = vst.msk [vmem:[#allocation2 + $0x18] sm:$0xff] %vm162_vm1, %v230_v59  ;;  %v268_v1 = vmul.f32 %v252_v60, %v236_v61 }
 0x13d   :  { %279 = vst.msk [vmem:[#allocation11 + $0x40] sm:$0xff] %vm162_vm1, %v262_v62 }
 0x13e   :  { %281 = vst.msk [vmem:[#allocation11 + $0x50] sm:$0xff] %vm162_vm1, %v264_v63 }
 0x13f   :  { %283 = vst.msk [vmem:[#allocation11 + $0x60] sm:$0xff] %vm162_vm1, %v266_v0 }
 0x140   :  { %285 = vst.msk [vmem:[#allocation11 + $0x70] sm:$0xff] %vm162_vm1, %v268_v1 }
 0x142   :  { %v237_v6 = vld [vmem:[#allocation2 + $0x18] sm:$0xff] }
 0x143   :  { %v263_v7 = vmul.f32 %v247_v2, %v237_v6  ;;  %v265_v8 = vmul.f32 %v249_v3, %v237_v6  ;;  %v267_v9 = vmul.f32 %v251_v4, %v237_v6  ;;  %v269_v10 = vmul.f32 %v253_v5, %v237_v6 }
 0x145   :  { %280 = vst.msk [vmem:[#allocation11 + $0x48] sm:$0xff] %vm162_vm1, %v263_v7 }
 0x146   :  { %282 = vst.msk [vmem:[#allocation11 + $0x58] sm:$0xff] %vm162_vm1, %v265_v8 }
 0x147   :  { %284 = vst.msk [vmem:[#allocation11 + $0x68] sm:$0xff] %vm162_vm1, %v267_v9 }
 0x148   :  { %286 = vst.msk [vmem:[#allocation11 + $0x78] sm:$0xff] %vm162_vm1, %v269_v10 }
 0x149   :  { %299 = dma.vmem_to_hbm [thread:$0]  %s292_s16, 2048, %s294_s19, [#allocation5], %s452_s9, %s452_s9, %s453_s10  }
 0x14a   :  { %447 = dma.done.wait [#allocation5], 2048  }
 0x14b   :  { %448 = vsyncadd [#allocation5], 4294965248 }
 0x14c   :  { %304 = vsyncpa [#allocation4], 1 }
 0x14d   :  { %305 = vsyncpa [#allocation9], 1 }
 0x14e   :  { %306 = vsyncpa [#allocation5], 1 }
 0x14f   :  { %307 = vsyncpa [#allocation6], 1 }

</bundles_post_ra>
